<compile_context>
chip_gen: v7x
topology: tpu7x:2x2x1
jax: 0.10.0
libtpu: 0.0.40
codegen_flags: <defaults>
</compile_context>

<pallas_src>
import jax
import jax.numpy as jnp
from jax.experimental import pallas as pl
from jax.experimental.pallas import tpu as pltpu


def _attention_kernel(inp_ref, ctx_ref, mask_ref, w_ctx_ref, b_ctx_ref, v_ref,
                      hidden_ref, alpha_ref):
    tb, seq, in_dim = ctx_ref.shape
    hidden_dim = w_ctx_ref.shape[1]

    # Conv1d(kernel=1) over context == per-position linear.  Flatten the batch
    # block into the M dim so the MXU sees one (TB*seq, in) @ (in, H) matmul.
    c2d = ctx_ref[...].reshape(tb * seq, in_dim)
    ctx = jnp.dot(c2d, w_ctx_ref[...], preferred_element_type=jnp.float32)
    ctx = ctx.reshape(tb, seq, hidden_dim) + b_ctx_ref[...]            # (TB, S, H) f32

    # att[b, s] = sum_h V[h] * tanh(inp[b, h] + ctx[b, s, h])
    t = jnp.tanh(ctx + inp_ref[...][:, None, :])                       # (TB, S, H)
    att = jnp.sum(t * v_ref[...][None, :, :], axis=-1)                 # (TB, S)

    # Masked positions -> -inf (PyTorch: att[mask] = -inf), softmax over seq.
    # Softmax reduction is strictly per-row (axis=-1), independent of batch flattening.
    att = jnp.where(mask_ref[...] != 0, -jnp.inf, att)
    att_max = jnp.max(att, axis=-1, keepdims=True)
    e = jnp.exp(att - att_max)
    alpha = e / jnp.sum(e, axis=-1, keepdims=True)                     # (TB, S)

    # hidden[b, h] = sum_s ctx[b, s, h] * alpha[b, s]  (batched over TB).
    hidden = jnp.sum(ctx * alpha[:, :, None], axis=1)                  # (TB, H)

    hidden_ref[...] = hidden
    alpha_ref[...] = alpha


def attention_forward(x, context, mask, params, *,
                      matmul_dtype=jnp.bfloat16, block_b=None):
    """x: (B, input_dim) f32, context: (B, seq, input_dim) f32, mask: (B, seq) bool."""
    B, input_dim = x.shape
    _, seq, _ = context.shape
    hidden_dim = params["w_in"].shape[0]

    # --- Hoisted query projection: one (B, in) @ (in, H) XLA matmul (removes the
    #     per-grid-step M=1 matmul and keeps w_in/b_in out of VMEM). ---
    inp = (x @ jnp.asarray(params["w_in"]).T + params["b_in"]).astype(jnp.float32)  # (B, H)

    w_ctx_t = jnp.asarray(params["w_ctx"]).T.astype(matmul_dtype)      # (in, H)
    b_ctx = jnp.asarray(params["b_ctx"], jnp.float32)[None, :]         # (1, H)
    v = jnp.asarray(params["v"], jnp.float32)[None, :]                 # (1, H)

    # --- Pad seq to a sublane multiple so the in-kernel flatten is layout-clean.
    #     Padded positions are masked (True) -> alpha == 0 there. ---
    seq_pad = ((seq + 7) // 8) * 8
    if seq_pad != seq:
        context = jnp.pad(context, ((0, 0), (0, seq_pad - seq), (0, 0)))
        mask = jnp.pad(mask, ((0, 0), (0, seq_pad - seq)), constant_values=True)

    # --- Pick the batch block: TB*seq fills the MXU M dim (>=256 rows when
    #     possible) while the double-buffered context tile stays well inside
    #     v7x's 64 MiB VMEM. ---
    if block_b is None:
        itemsize = jnp.dtype(matmul_dtype).itemsize
        bytes_per_b = seq_pad * input_dim * itemsize
        vmem_cap_tb = max(1, (12 * 1024 * 1024) // max(1, 2 * bytes_per_b))
        rows_tb = (256 + seq_pad - 1) // seq_pad
        block_b = max(1, min(B, rows_tb, vmem_cap_tb, 512))
    if block_b >= B:
        block_b = B                              # single block = full array dims
    else:
        block_b = max(8, (block_b // 8) * 8)     # keep sublane-aligned blocks

    b_pad = ((B + block_b - 1) // block_b) * block_b
    if b_pad != B:
        inp = jnp.pad(inp, ((0, b_pad - B), (0, 0)))
        context = jnp.pad(context, ((0, b_pad - B), (0, 0), (0, 0)))
        # Padded batch rows are fully *valid* so their softmax stays finite.
        mask = jnp.pad(mask, ((0, b_pad - B), (0, 0)), constant_values=False)

    ctx_in = context.astype(matmul_dtype)
    mask_i = mask.astype(jnp.int32)

    grid = (b_pad // block_b,)
    row2 = lambda i: (i, 0)
    row3 = lambda i: (i, 0, 0)
    fixed = lambda i: (0, 0)

    flops = (2 * b_pad * seq_pad * input_dim * hidden_dim     # ctx matmul
             + 4 * b_pad * seq_pad * hidden_dim)              # att dot + hidden contraction
    transcendentals = b_pad * seq_pad * hidden_dim + b_pad * seq_pad
    bytes_accessed = (ctx_in.size * ctx_in.dtype.itemsize
                      + inp.size * 4 + mask_i.size * 4
                      + w_ctx_t.size * w_ctx_t.dtype.itemsize
                      + (b_ctx.size + v.size) * 4
                      + b_pad * (hidden_dim + seq_pad) * 4)

    hidden_p, alpha_p = pl.pallas_call(
        _attention_kernel,
        out_shape=(jax.ShapeDtypeStruct((b_pad, hidden_dim), jnp.float32),
                   jax.ShapeDtypeStruct((b_pad, seq_pad), jnp.float32)),
        grid=grid,
        in_specs=[
            pl.BlockSpec((block_b, hidden_dim), row2),           # inp (hoisted query proj)
            pl.BlockSpec((block_b, seq_pad, input_dim), row3),   # context
            pl.BlockSpec((block_b, seq_pad), row2),              # mask (int32)
            pl.BlockSpec((input_dim, hidden_dim), fixed),        # W_ctx^T (constant block)
            pl.BlockSpec((1, hidden_dim), fixed),                # b_ctx
            pl.BlockSpec((1, hidden_dim), fixed),                # V
        ],
        out_specs=(pl.BlockSpec((block_b, hidden_dim), row2),    # lane-dense 2-D slabs
                   pl.BlockSpec((block_b, seq_pad), row2)),
        compiler_params=pltpu.CompilerParams(
            dimension_semantics=("parallel",),                   # megacore over batch blocks
            vmem_limit_bytes=48 * 1024 * 1024),                  # fits v7x's 64 MiB VMEM
        cost_estimate=pl.CostEstimate(flops=int(flops),
                                      transcendentals=int(transcendentals),
                                      bytes_accessed=int(bytes_accessed)),
    )(inp, ctx_in, mask_i, w_ctx_t, b_ctx, v)

    return hidden_p[:B], alpha_p[:B, :seq]


def attention_reference(x, context, mask, params):
    """Pure-JAX reference mirroring the PyTorch forward."""
    inp = x @ params["w_in"].T + params["b_in"]                                   # (B, H)
    ctx = jnp.einsum("bsi,hi->bsh", context, params["w_ctx"]) + params["b_ctx"]   # (B, S, H)
    att = jnp.einsum("h,bsh->bs", params["v"], jnp.tanh(inp[:, None, :] + ctx))   # (B, S)
    att = jnp.where(mask, -jnp.inf, att)
    alpha = jax.nn.softmax(att, axis=-1)                                          # (B, S)
    hidden = jnp.einsum("bsh,bs->bh", ctx, alpha)                                 # (B, H)
    return hidden, alpha


def init_params(key, input_dim, hidden_dim):
    k1, k2, k3, k4, k5 = jax.random.split(key, 5)
    bound_lin = 1.0 / jnp.sqrt(input_dim)
    return {
        # nn.Linear(input_dim, hidden_dim)
        "w_in": jax.random.uniform(k1, (hidden_dim, input_dim), jnp.float32,
                                   -bound_lin, bound_lin),
        "b_in": jax.random.uniform(k2, (hidden_dim,), jnp.float32,
                                   -bound_lin, bound_lin),
        # nn.Conv1d(input_dim, hidden_dim, 1, 1) -> weight (H, in, 1) collapsed to (H, in)
        "w_ctx": jax.random.uniform(k3, (hidden_dim, input_dim), jnp.float32,
                                    -bound_lin, bound_lin),
        "b_ctx": jax.random.uniform(k4, (hidden_dim,), jnp.float32,
                                    -bound_lin, bound_lin),
        # V ~ uniform(-1, 1)
        "v": jax.random.uniform(k5, (hidden_dim,), jnp.float32, -1.0, 1.0),
    }


if __name__ == "__main__":
    B, S, INPUT_DIM, HIDDEN_DIM = 2, 8, 16, 32

    key = jax.random.PRNGKey(0)
    kp, kx, kc = jax.random.split(key, 3)
    params = init_params(kp, INPUT_DIM, HIDDEN_DIM)

    context = jax.random.normal(kx, (B, S, INPUT_DIM), jnp.float32)   # context sequence
    inp = jax.random.normal(kc, (B, INPUT_DIM), jnp.float32)          # query input
    # mask: True == masked (set to -inf before softmax); keep >=1 valid per row.
    mask = jnp.array([[False, False, False, False, False, True, True, True],
                      [False, False, False, False, False, False, False, True]])

    hidden_ref, alpha_ref = attention_reference(inp, context, mask, params)

    # Exact f32 path (tight check).
    hidden_f32, alpha_f32 = attention_forward(inp, context, mask, params,
                                              matmul_dtype=jnp.float32)
    jax.block_until_ready((hidden_f32, alpha_f32))
    assert jnp.allclose(hidden_f32, hidden_ref, atol=1e-5, rtol=1e-5), "hidden mismatch (f32)"
    assert jnp.allclose(alpha_f32, alpha_ref, atol=1e-5, rtol=1e-5), "alpha mismatch (f32)"

    # bf16 MXU fast path (default; v6e/v7x) -- looser numerical check.
    hidden_bf16, alpha_bf16 = attention_forward(inp, context, mask, params)
    jax.block_until_ready((hidden_bf16, alpha_bf16))
    assert jnp.allclose(hidden_bf16, hidden_ref, atol=5e-2, rtol=5e-2), "hidden mismatch (bf16)"
    assert jnp.allclose(alpha_bf16, alpha_ref, atol=5e-2, rtol=5e-2), "alpha mismatch (bf16)"

    print("KERNEL_OK")
</pallas_src>

<mosaic_0001>
module attributes {stable_mosaic.version = 11 : i64} {
  func.func @_attention_kernel(%arg0: i32, %arg1: memref<2x32xf32, #tpu.memory_space<vmem>>, %arg2: memref<2x8x16xf32, #tpu.memory_space<vmem>>, %arg3: memref<2x8xi32, #tpu.memory_space<vmem>>, %arg4: memref<16x32xf32, #tpu.memory_space<vmem>>, %arg5: memref<1x32xf32, #tpu.memory_space<vmem>>, %arg6: memref<1x32xf32, #tpu.memory_space<vmem>>, %arg7: memref<2x32xf32, #tpu.memory_space<vmem>>, %arg8: memref<2x8xf32, #tpu.memory_space<vmem>>) attributes {dimension_semantics = [#tpu.dimension_semantics<parallel>], iteration_bounds = array<i64: 1>, scalar_prefetch = 0 : i64, scratch_operands = 0 : i64, tpu.core_type = #tpu.core_type<tc>, window_params = [{transform_indices = @transform_0, window_bounds = array<i64: 2, 32>}, {transform_indices = @transform_1, window_bounds = array<i64: 2, 8, 16>}, {transform_indices = @transform_2, window_bounds = array<i64: 2, 8>}, {pipeline_mode = #tpu.pipeline_mode<synchronous>, transform_indices = @transform_3, window_bounds = array<i64: 16, 32>}, {pipeline_mode = #tpu.pipeline_mode<synchronous>, transform_indices = @transform_4, window_bounds = array<i64: 1, 32>}, {pipeline_mode = #tpu.pipeline_mode<synchronous>, transform_indices = @transform_5, window_bounds = array<i64: 1, 32>}, {transform_indices = @transform_6, window_bounds = array<i64: 2, 32>}, {transform_indices = @transform_7, window_bounds = array<i64: 2, 8>}]} {
    %c0 = arith.constant 0 : index
    %c0_0 = arith.constant 0 : index
    %c0_1 = arith.constant 0 : index
    %0 = vector.load %arg2[%c0, %c0_0, %c0_1] : memref<2x8x16xf32, #tpu.memory_space<vmem>>, vector<2x8x16xf32>
    %1 = vector.shape_cast %0 : vector<2x8x16xf32> to vector<16x16xf32>
    %c0_2 = arith.constant 0 : index
    %c0_3 = arith.constant 0 : index
    %2 = vector.load %arg4[%c0_2, %c0_3] : memref<16x32xf32, #tpu.memory_space<vmem>>, vector<16x32xf32>
    %cst = arith.constant dense<0.000000e+00> : vector<16x32xf32>
    %3 = tpu.matmul %1, %2, %cst {dimension_numbers = #tpu.dot_dimension_numbers<[1], [0], [0], [1], [0, 0, 1, 1], [], []>} : vector<16x16xf32>, vector<16x32xf32>, vector<16x32xf32> -> vector<16x32xf32>
    %4 = vector.shape_cast %3 : vector<16x32xf32> to vector<2x8x32xf32>
    %c0_4 = arith.constant 0 : index
    %c0_5 = arith.constant 0 : index
    %5 = vector.load %arg5[%c0_4, %c0_5] : memref<1x32xf32, #tpu.memory_space<vmem>>, vector<1x32xf32>
    %6 = vector.shape_cast %5 : vector<1x32xf32> to vector<1x1x32xf32>
    %7 = vector.broadcast %6 : vector<1x1x32xf32> to vector<2x8x32xf32>
    %8 = arith.addf %4, %7 : vector<2x8x32xf32>
    %c0_6 = arith.constant 0 : index
    %c0_7 = arith.constant 0 : index
    %9 = vector.load %arg1[%c0_6, %c0_7] : memref<2x32xf32, #tpu.memory_space<vmem>>, vector<2x32xf32>
    %10 = vector.shape_cast %9 : vector<2x32xf32> to vector<2x1x32xf32>
    %11 = vector.broadcast %10 : vector<2x1x32xf32> to vector<2x8x32xf32>
    %12 = arith.addf %8, %11 : vector<2x8x32xf32>
    %13 = math.tanh %12 : vector<2x8x32xf32>
    %c0_8 = arith.constant 0 : index
    %c0_9 = arith.constant 0 : index
    %14 = vector.load %arg6[%c0_8, %c0_9] : memref<1x32xf32, #tpu.memory_space<vmem>>, vector<1x32xf32>
    %15 = vector.shape_cast %14 : vector<1x32xf32> to vector<1x1x32xf32>
    %16 = vector.broadcast %15 : vector<1x1x32xf32> to vector<2x8x32xf32>
    %17 = arith.mulf %13, %16 : vector<2x8x32xf32>
    %cst_10 = arith.constant dense<0.000000e+00> : vector<2x8xf32>
    %18 = vector.multi_reduction <add>, %17, %cst_10 [2] : vector<2x8x32xf32> to vector<2x8xf32>
    %c0_11 = arith.constant 0 : index
    %c0_12 = arith.constant 0 : index
    %19 = vector.load %arg3[%c0_11, %c0_12] : memref<2x8xi32, #tpu.memory_space<vmem>>, vector<2x8xi32>
    %c0_i32 = arith.constant 0 : i32
    %20 = vector.broadcast %c0_i32 : i32 to vector<2x8xi32>
    %21 = arith.cmpi ne, %19, %20 : vector<2x8xi32>
    %cst_13 = arith.constant 0xFF800000 : f32
    %22 = vector.broadcast %cst_13 : f32 to vector<2x8xf32>
    %23 = arith.select %21, %22, %18 : vector<2x8xi1>, vector<2x8xf32>
    %cst_14 = arith.constant dense<0xFF800000> : vector<2xf32>
    %24 = vector.multi_reduction <maximumf>, %23, %cst_14 [1] : vector<2x8xf32> to vector<2xf32>
    %25 = vector.shape_cast %24 : vector<2xf32> to vector<2x1xf32>
    %26 = vector.broadcast %25 : vector<2x1xf32> to vector<2x8xf32>
    %27 = arith.subf %23, %26 : vector<2x8xf32>
    %28 = math.exp %27 : vector<2x8xf32>
    %cst_15 = arith.constant dense<0.000000e+00> : vector<2xf32>
    %29 = vector.multi_reduction <add>, %28, %cst_15 [1] : vector<2x8xf32> to vector<2xf32>
    %30 = vector.shape_cast %29 : vector<2xf32> to vector<2x1xf32>
    %31 = vector.broadcast %30 : vector<2x1xf32> to vector<2x8xf32>
    %32 = arith.divf %28, %31 : vector<2x8xf32>
    %33 = vector.shape_cast %32 : vector<2x8xf32> to vector<2x8x1xf32>
    %34 = vector.broadcast %33 : vector<2x8x1xf32> to vector<2x8x32xf32>
    %35 = arith.mulf %8, %34 : vector<2x8x32xf32>
    %cst_16 = arith.constant dense<0.000000e+00> : vector<2x32xf32>
    %36 = vector.multi_reduction <add>, %35, %cst_16 [1] : vector<2x8x32xf32> to vector<2x32xf32>
    %c0_17 = arith.constant 0 : index
    %c0_18 = arith.constant 0 : index
    %37 = vector.load %arg7[%c0_17, %c0_18] : memref<2x32xf32, #tpu.memory_space<vmem>>, vector<2x32xf32>
    tpu.vector_store %arg7[%c0_17, %c0_18], %36 {strides = array<i32>} : memref<2x32xf32, #tpu.memory_space<vmem>>, vector<2x32xf32>,
    %c0_19 = arith.constant 0 : index
    %c0_20 = arith.constant 0 : index
    %38 = vector.load %arg8[%c0_19, %c0_20] : memref<2x8xf32, #tpu.memory_space<vmem>>, vector<2x8xf32>
    tpu.vector_store %arg8[%c0_19, %c0_20], %32 {strides = array<i32>} : memref<2x8xf32, #tpu.memory_space<vmem>>, vector<2x8xf32>,
    return
  }
  func.func @transform_0(%arg0: i32) -> (i32, i32) {
    %c0_i32 = arith.constant 0 : i32
    %c0_i32_0 = arith.constant 0 : i32
    return %arg0, %c0_i32 : i32, i32
  }
  func.func @transform_1(%arg0: i32) -> (i32, i32, i32) {
    %c0_i32 = arith.constant 0 : i32
    %c0_i32_0 = arith.constant 0 : i32
    %c0_i32_1 = arith.constant 0 : i32
    return %arg0, %c0_i32, %c0_i32_0 : i32, i32, i32
  }
  func.func @transform_2(%arg0: i32) -> (i32, i32) {
    %c0_i32 = arith.constant 0 : i32
    %c0_i32_0 = arith.constant 0 : i32
    return %arg0, %c0_i32 : i32, i32
  }
  func.func @transform_3(%arg0: i32) -> (i32, i32) {
    %c0_i32 = arith.constant 0 : i32
    %c0_i32_0 = arith.constant 0 : i32
    %c0_i32_1 = arith.constant 0 : i32
    return %c0_i32, %c0_i32_0 : i32, i32
  }
  func.func @transform_4(%arg0: i32) -> (i32, i32) {
    %c0_i32 = arith.constant 0 : i32
    %c0_i32_0 = arith.constant 0 : i32
    %c0_i32_1 = arith.constant 0 : i32
    return %c0_i32, %c0_i32_0 : i32, i32
  }
  func.func @transform_5(%arg0: i32) -> (i32, i32) {
    %c0_i32 = arith.constant 0 : i32
    %c0_i32_0 = arith.constant 0 : i32
    %c0_i32_1 = arith.constant 0 : i32
    return %c0_i32, %c0_i32_0 : i32, i32
  }
  func.func @transform_6(%arg0: i32) -> (i32, i32) {
    %c0_i32 = arith.constant 0 : i32
    %c0_i32_0 = arith.constant 0 : i32
    return %arg0, %c0_i32 : i32, i32
  }
  func.func @transform_7(%arg0: i32) -> (i32, i32) {
    %c0_i32 = arith.constant 0 : i32
    %c0_i32_0 = arith.constant 0 : i32
    return %arg0, %c0_i32 : i32, i32
  }
}

</mosaic_0001>

<bundles_post_ra>
// kernel: tpu_custom_call.1
= control target key start
LH: loop header
LB: loop body
LE: loop exit
PB: predicated region body
PF: predicated region fallthrough
CT: control target
= control target key end

     0   :  { %13 = vsyncpa [#allocation3], 0  ;;  %s606_s0 = inlined_call_operand.hbm [shape: f32[2,32], index: 0, kind: input, shape index: {}]   ;;  %s607_s1 = inlined_call_operand.hbm [shape: f32[2,8,16], index: 1, kind: input, shape index: {}]   ;;  %s608_s2 = inlined_call_operand.vmem [shape: s32[2,8], index: 2, kind: input, shape index: {}]   ;;  %s609_s3 = inlined_call_operand.hbm [shape: f32[16,32], index: 3, kind: input, shape index: {}]   ;;  %s610_s4 = inlined_call_operand.vmem [shape: f32[1,32], index: 4, kind: input, shape index: {}]   ;;  %s611_s5 = inlined_call_operand.vmem [shape: f32[1,32], index: 5, kind: input, shape index: {}]   ;;  %s612_s6 = inlined_call_operand.hbm [shape: f32[2,32], index: 6, kind: output, shape index: {0}]   ;;  %s613_s7 = inlined_call_operand.hbm [shape: f32[2,8], index: 7, kind: output, shape index: {1}]  }
   0x1   :  { %14 = vsyncpa [#allocation6], 0 }
   0x2   :  { %15 = vsyncpa [#allocation4], 0 }
   0x3   :  { %16 = vsyncpa [#allocation10], 0  ;;  %s466_s24 = smov [#allocation5]   ;;  %s348_s28 = scalar_lea.hbm %s607_s1, 256 }
   0x4   :  { %s32_s25 = sshll.u32 %s466_s24, 4  ;;  %p349_p0 = scmp.ne.s32.totalorder %s607_s1, %s348_s28  ;;  %s33_s25 = int_to_ptr.vmem [resolvable:$true] %s32_s25 }
   0x5   :  { %p352_p1 = scmp.lt.u32.totalorder %s348_s28, %s607_s1 }
   0x7   :  { %p354_p2 = pnand %p352_p1, %p349_p0 }
   0x9   :  { %357 = shalt.err (!%p354_p2)
}
   0xa   :  { %s358_s10 = scalar_lea.vmem %s33_s25, 256  ;;  %p363_p4 = scmp.lt.s32.totalorder %s33_s25, %s33_s25 }
   0xb   :  { %p359_p3 = scmp.ne.s32.totalorder %s33_s25, %s358_s10  ;;  %p364_p5 = scmp.lt.s32.totalorder %s358_s10, %s358_s10 }
   0xd   :  { %p365_p6 = por %p364_p5, %p363_p4 }
   0xf   :  { %p366_p7 = pnand %p365_p6, %p359_p3 }
  0x11   :  { %369 = shalt.err (!%p366_p7)
}
  0x12   :  { %s467_s11 = smov 128   ;;  %s468_s12 = smov 8  }
  0x13   :  { %38 = dma.hbm_to_vmem [thread:$0]  %s607_s1, 256, %s33_s25, [#allocation6], %s467_s11, %s467_s11, %s468_s12  }
  0x14   :  { %s469_s15 = smov [#allocation2]   ;;  %s470_s17 = smov [#allocation7]  }
  0x15   :  { %s23_s16 = sshll.u32 %s469_s15, 4  ;;  %s46_s18 = sshll.u32 %s470_s17, 4  ;;  %s24_s16 = int_to_ptr.vmem [resolvable:$true] %s23_s16  ;;  %s47_s18 = int_to_ptr.vmem [resolvable:$true] %s46_s18 }
  0x16   :  { %s370_s21 = scalar_lea.hbm %s606_s0, 32 }
  0x17   :  { %p371_p8 = scmp.ne.s32.totalorder %s606_s0, %s370_s21  ;;  %p374_p9 = scmp.lt.u32.totalorder %s370_s21, %s606_s0 }
  0x19   :  { %p376_p10 = pnand %p374_p9, %p371_p8 }
  0x1b   :  { %379 = shalt.err (!%p376_p10)
}
  0x1c   :  { %s380_s1 = scalar_lea.vmem %s24_s16, 32  ;;  %p385_p12 = scmp.lt.s32.totalorder %s24_s16, %s24_s16 }
  0x1d   :  { %p381_p11 = scmp.ne.s32.totalorder %s24_s16, %s380_s1  ;;  %p386_p13 = scmp.lt.s32.totalorder %s380_s1, %s380_s1 }
  0x1f   :  { %p387_p0 = por %p386_p13, %p385_p12 }
  0x21   :  { %p388_p1 = pnand %p387_p0, %p381_p11 }
  0x23   :  { %391 = shalt.err (!%p388_p1)
}
  0x24   :  { %26 = dma.hbm_to_vmem [thread:$0]  %s606_s0, 32, %s24_s16, [#allocation3]  }
  0x25   :  { %s392_s30 = scalar_lea.hbm %s609_s3, 256 }
  0x26   :  { %p393_p2 = scmp.ne.s32.totalorder %s609_s3, %s392_s30  ;;  %p396_p3 = scmp.lt.u32.totalorder %s392_s30, %s609_s3 }
  0x28   :  { %p398_p4 = pnand %p396_p3, %p393_p2 }
  0x2a   :  { %401 = shalt.err (!%p398_p4)
}
  0x2b   :  { %s402_s14 = scalar_lea.vmem %s47_s18, 256  ;;  %p407_p6 = scmp.lt.s32.totalorder %s47_s18, %s47_s18 }
  0x2c   :  { %p403_p5 = scmp.ne.s32.totalorder %s47_s18, %s402_s14  ;;  %p408_p7 = scmp.lt.s32.totalorder %s402_s14, %s402_s14 }
  0x2e   :  { %p409_p8 = por %p408_p7, %p407_p6 }
  0x30   :  { %p410_p9 = pnand %p409_p8, %p403_p5 }
  0x32   :  { %413 = shalt.err (!%p410_p9)
}
  0x33   :  { %52 = dma.hbm_to_vmem [thread:$0]  %s609_s3, 256, %s47_s18, [#allocation6], %s467_s11, %s467_s11, %s468_s12  }
  0x34   :  { %458 = dma.done.wait [#allocation3], 32  }
  0x35   :  { %459 = vsyncadd [#allocation3], 4294967264 }
  0x36   :  { %460 = dma.done.wait [#allocation6], 512  }
  0x37   :  { %461 = vsyncadd [#allocation6], 4294966784  ;;  %vm70_vm0 = vcmask 130048   ;;  %v68_v0 = vld [vmem:[#allocation7] sm:$0xff]  ;;  %v69_v1 = vld [vmem:[#allocation7 + $0x8] sm:$0xff]  ;;  %v174_v7 = vlaneseq  ;;  %vm208_vm1 = vcmask 261120  }
  0x38   :  { %v66_v2 = vld [vmem:[#allocation5] sm:$0xff]  ;;  %v328_v3 = vpack.c.bf16 %v69_v1, %v68_v0  ;;  %v67_v4 = vld [vmem:[#allocation5 + $0x8] sm:$0xff]  ;;  %v471_v5 = vmov 1966171168   ;;  %v314_v16 = vld [vmem:[%s610_s4] ss:$0 sm:$0xff] }
  0x39   :  { %325 = vmatprep.mubr.msk.f32.mxu0 %vm70_vm0, %v66_v2  ;;  %v172_v6 = vunpack.c.l.s4 %v471_v5  ;;  %v175_v9 = vshrl.u32 %v174_v7, 7  ;;  %v315_v10 = vld.sshfl [vmem:[#allocation2] sm:$0x11 pattern:$0x75316420]  ;;  %v220_v32 = vand.u32 127, %v174_v7 }
  0x3a   :  { %329 = vmatprep.subr.bf16.mxu0 %v328_v3  ;;  %v170_v11 = vcombine.high %v315_v10, %v315_v10  ;;  %v316_v25 = vld [vmem:[%s611_s5] ss:$0 sm:$0xff]  ;;  %vm229_vm2 = vcmask 1041409   ;;  %vm233_vm4 = vcmask 58368  }
  0x3b   :  { %331 = vmatpush3.bf16.msra.mxu0 %v328_v3  ;;  %v173_v8 = vunpack.c.0.s8 %v172_v6  ;;  %v187_v14 = vsub.s32 0, %v175_v9  ;;  %v223_v34 = vsub.s32 %v220_v32, %v175_v9  ;;  %v215_v35 = vld [vmem:[%s608_s2] sm:$0x3]  ;;  %v254_v48 = vsub.s32 1, %v175_v9  ;;  %s472_s2 = smov [#allocation9]  }
  0x3c   :  { %vm216_vm3 = vcmp.ne.s32.totalorder %v215_v35, 0  ;;  %s298_s5 = sshll.u32 %s472_s2, 4  ;;  %s299_s5 = int_to_ptr.vmem [resolvable:$true] %s298_s5 }
  0x3d   :  { %v176_v12 = vsub.s32 %v173_v8, %v175_v9  ;;  %s414_s18 = scalar_lea.vmem %s299_s5, 32  ;;  %p419_p11 = scmp.lt.s32.totalorder %s299_s5, %s299_s5 }
  0x3e   :  { %326 = vmatmul.mubr.msk.f32.vlgmr.msra.gmra.mrb[0].mxu0 %vm70_vm0, %v67_v4  ;;  %p415_p10 = scmp.ne.s32.totalorder %s299_s5, %s414_s18  ;;  %p420_p12 = scmp.lt.s32.totalorder %s414_s18, %s414_s18 }
  0x3f   :  { %v184_v13 = vrot.slane %v170_v11, %v176_v12  ;;  %v177_v15 = vrot.slane %v315_v10, %v176_v12 }
  0x40   :  { %p421_p13 = por %p420_p12, %p419_p11 }
  0x41   :  { %v192_v17 = vrot.slane %v184_v13, %v187_v14  ;;  %v188_v19 = vrot.slane %v177_v15, %v187_v14 }
  0x42   :  { %p422_p0 = pnand %p421_p13, %p415_p10 }
 0x111   :  { %v327_v18 = vpop.f32.mrb[0].mxu0 }
 0x112   :  { %v559_v20 = vadd.f32 %v327_v18, %v314_v16  ;;  %v143_v21 = vpop.f32.mrb[1].mxu0 }
 0x113   :  { %v561_v22 = vadd.f32 %v314_v16, %v143_v21 }
 0x114   :  { %v196_v23 = vadd.f32 %v192_v17, %v559_v20 }
 0x115   :  { %v195_v24 = vadd.f32 %v188_v19, %v561_v22 }
 0x116   :  { %340 = vtanh.f32 %v196_v23 }
 0x117   :  { %342 = vtanh.f32 %v195_v24 }
 0x120   :  { %v341_v26 = vpop.eup %340 }
 0x121   :  { %v343_v27 = vpop.eup %342  ;;  %v207_v30 = vmul.f32 %v341_v26, %v316_v25 }
 0x122   :  { %v206_v28 = vmul.f32 %v343_v27, %v316_v25 }
 0x123   :  { %v212_v31 = vsel %vm208_vm1, %v207_v30, 0.0 }
 0x124   :  { %v209_v29 = vsel %vm208_vm1, %v206_v28, 0.0 }
 0x125   :  { %210 = vadd.xlane.f32.xlu0 %v209_v29 }
 0x129   :  { %213 = vadd.xlane.f32.xlu0 %v212_v31 }
 0x1b2   :  { %v211_v33 = vpop.xlane.xlu0 %210 }
 0x1b3   :  { %v224_v37 = vrot.slane %v211_v33, %v223_v34 }
 0x1b6   :  { %v214_v36 = vpop.xlane.xlu0 %213 }
 0x1b7   :  { %v228_v38 = vrot.slane %v214_v36, %v223_v34 }
 0x1b9   :  { %v230_v39 = vsel %vm229_vm2, %v228_v38, %v224_v37 }
 0x1ba   :  { %v232_v40 = vsel %vm216_vm3, -inf, %v230_v39 }
 0x1bb   :  { %v234_v41 = vsel %vm233_vm4, %v232_v40, -inf }
 0x1bc   :  { %235 = vmax.xlane.f32.xlu1 %v234_v41 }
 0x249   :  { %v236_v42 = vpop.xlane.xlu1 %235 }
 0x24a   :  { %v237_v43 = vsub.f32 %v232_v40, %v236_v42 }
 0x24c   :  { %v238_v44 = vmul.f32 1.442695, %v237_v43 }
 0x24e   :  { %344 = vpow2.f32 %v238_v44 }
 0x258   :  { %v345_v45 = vpop.eup %344 }
 0x259   :  { %v240_v46 = vsel %vm233_vm4, %v345_v45, 0.0 }
 0x25a   :  { %241 = vadd.xlane.f32.xlu1 %v240_v46 }
 0x2e7   :  { %v242_v47 = vpop.xlane.xlu1 %241 }
 0x2e8   :  { %346 = vrcp.f32 %v242_v47 }
 0x2f2   :  { %v347_v49 = vpop.eup %346 }
 0x2f3   :  { %v244_v50 = vmul.f32 %v347_v49, %v345_v45 }
 0x2f5   :  { %v255_v51 = vrot.slane %v244_v50, %v254_v48  ;;  %281 = vst.msk [vmem:[#allocation9] sm:$0x3] %vm233_vm4, %v244_v50  ;;  %v248_v52 = vrot.slane %v244_v50, %v187_v14 }
 0x2f7   :  { %257 = vbcast.lane.b32.xlu1 %v255_v51, 256  ;;  %250 = vbcast.lane.b32.xlu0 %v248_v52, 256 }
 0x2f8   :  { %425 = shalt.err (!%p422_p0)
}
 0x2f9   :  { %s426_s21 = scalar_lea.hbm %s613_s7, 32 }
 0x2fa   :  { %p427_p1 = scmp.ne.s32.totalorder %s613_s7, %s426_s21  ;;  %p430_p2 = scmp.lt.u32.totalorder %s426_s21, %s613_s7 }
 0x2fc   :  { %p432_p3 = pnand %p430_p2, %p427_p1 }
 0x2fe   :  { %435 = shalt.err (!%p432_p3)
}
 0x2ff   :  { %301 = dma.vmem_to_hbm [thread:$0]  %s299_s5, 32, %s613_s7, [#allocation10]   ;;  %vm279_vm5 = vcmask 254976  }
 0x300   :  { %s473_s7 = smov [#allocation8]  }
 0x301   :  { %s288_s27 = sshll.u32 %s473_s7, 4  ;;  %s289_s27 = int_to_ptr.vmem [resolvable:$true] %s288_s27 }
 0x302   :  { %s436_s28 = scalar_lea.vmem %s289_s27, 32  ;;  %p441_p5 = scmp.lt.s32.totalorder %s289_s27, %s289_s27 }
 0x303   :  { %p437_p4 = scmp.ne.s32.totalorder %s289_s27, %s436_s28  ;;  %p442_p6 = scmp.lt.s32.totalorder %s436_s28, %s436_s28 }
 0x305   :  { %p443_p7 = por %p442_p6, %p441_p5 }
 0x307   :  { %p444_p8 = pnand %p443_p7, %p437_p4 }
 0x369   :  { %v258_v53 = vpop.permute.xlu1 %257  ;;  %v251_v54 = vpop.permute.xlu0 %250 }
 0x36a   :  { %v260_v55 = vmul.f32 %v258_v53, %v559_v20  ;;  %v259_v56 = vmul.f32 %v251_v54, %v561_v22 }
 0x36c   :  { %v268_v57 = vsel %vm208_vm1, %v260_v55, 0.0  ;;  %v261_v58 = vsel %vm208_vm1, %v259_v56, 0.0 }
 0x36d   :  { %v269_v59 = vrot.slane %v268_v57, 4  ;;  %v262_v60 = vrot.slane %v261_v58, 4 }
 0x36f   :  { %v270_v61 = vadd.f32 %v269_v59, %v268_v57  ;;  %v263_v62 = vadd.f32 %v262_v60, %v261_v58 }
 0x371   :  { %v271_v63 = vrot.slane %v270_v61, 2  ;;  %v264_v0 = vrot.slane %v263_v62, 2 }
 0x373   :  { %v272_v1 = vadd.f32 %v271_v63, %v270_v61  ;;  %v265_v2 = vadd.f32 %v264_v0, %v263_v62 }
 0x375   :  { %v273_v3 = vrot.slane %v272_v1, 1  ;;  %v266_v4 = vrot.slane %v265_v2, 1 }
 0x377   :  { %v274_v5 = vadd.f32 %v273_v3, %v272_v1  ;;  %v267_v6 = vadd.f32 %v266_v4, %v265_v2 }
 0x379   :  { %v277_v7 = vsel %vm229_vm2, %v274_v5, %v267_v6 }
 0x37a   :  { %280 = vst.msk [vmem:[#allocation8] sm:$0x3] %vm279_vm5, %v277_v7 }
 0x37b   :  { %447 = shalt.err (!%p444_p8)
}
 0x37c   :  { %s448_s8 = scalar_lea.hbm %s612_s6, 32 }
 0x37d   :  { %p449_p9 = scmp.ne.s32.totalorder %s612_s6, %s448_s8  ;;  %p452_p10 = scmp.lt.u32.totalorder %s448_s8, %s612_s6 }
 0x37f   :  { %p454_p11 = pnand %p452_p10, %p449_p9 }
 0x381   :  { %457 = shalt.err (!%p454_p11)
}
 0x382   :  { %291 = dma.vmem_to_hbm [thread:$0]  %s289_s27, 32, %s612_s6, [#allocation4]  }
 0x383   :  { %462 = dma.done.wait [#allocation4], 32  }
 0x384   :  { %463 = vsyncadd [#allocation4], 4294967264 }
 0x385   :  { %464 = dma.done.wait [#allocation10], 32  }
 0x386   :  { %465 = vsyncadd [#allocation10], 4294967264 }
 0x387   :  { %308 = vsyncpa [#allocation3], 1 }
 0x388   :  { %309 = vsyncpa [#allocation6], 1 }
 0x389   :  { %310 = vsyncpa [#allocation4], 1 }
 0x38a   :  { %311 = vsyncpa [#allocation10], 1 }

</bundles_post_ra>
